<compile_context>
chip_gen: v7x
topology: tpu7x:2x2x1
jax: 0.10.0
libtpu: 0.0.40
codegen_flags: <defaults>
</compile_context>

<pallas_src>
import functools
import math

import jax
import jax.numpy as jnp
from jax.experimental import pallas as pl
from jax.experimental.pallas import tpu as pltpu


def _arcface_kernel(cos_ref, label_ref, out_ref, *, s, s_cos_m, s_sin_m):
    c = cos_ref[...].astype(jnp.float32)                 # (TN, TC) f32
    # Shift the label strip into tile-local class coordinates instead of
    # adding col0 to every element of the (TN, TC) iota (one fewer full-tile
    # VALU op).
    col0 = pl.program_id(1) * cos_ref.shape[1]
    lab_local = label_ref[...] - col0                    # (TN, 1) i32
    col = jax.lax.broadcasted_iota(jnp.int32, c.shape, 1)
    onehot = col == lab_local                            # (TN, TC) bool
    sin_theta = jnp.sqrt(1.0 - c * c)                    # NaN outside [-1,1], like acos
    with_margin = c * s_cos_m - sin_theta * s_sin_m      # s already folded in
    out_ref[...] = jnp.where(onehot, with_margin, s * c).astype(out_ref.dtype)


def _round_up(x: int, m: int) -> int:
    return ((x + m - 1) // m) * m


def _pick_tile(dim_padded: int, target: int, mult: int) -> int:
    """Tile size (multiple of `mult`, <= target) minimizing padding of
    `dim_padded` up to a tile multiple; larger tiles preferred on ties."""
    t = min(target, dim_padded)
    t = max((t // mult) * mult, mult)
    best_t, best_waste = mult, None
    for cand in range(t, mult - 1, -mult):
        waste = _round_up(dim_padded, cand) - dim_padded
        if best_waste is None or waste < best_waste:
            best_t, best_waste = cand, waste
        if waste == 0:
            break
    return best_t


def _chip_defaults():
    """(row_tile_target, col_tile_target, vmem_limit_bytes) per TPU generation.

    Live double-buffered footprint is ~4x the tile bytes (in + out, 2 buffers
    each), so:
      v5e: ~2 MiB tiles ->  ~8 MiB live (16 MiB default scoped VMEM)
      v6e: ~8 MiB tiles -> ~32 MiB live (explicit 64 MiB cap, 128 MiB physical)
      v7x: ~4 MiB tiles -> ~16 MiB live (explicit 44 MiB cap,  64 MiB physical)
    """
    try:
        kind = jax.devices()[0].device_kind.lower()
    except Exception:  # CPU / interpret fallback
        kind = ""
    if "v5" in kind:
        return 256, 2048, None
    if "v6" in kind:
        return 256, 8192, 64 << 20
    if "v7" in kind or "7x" in kind:
        return 256, 4096, 44 << 20
    return 256, 2048, None  # conservative default for unknown parts


def arcface(cosine: jax.Array, label: jax.Array, s: float = 64.0, m: float = 0.5,
            row_tile: int | None = None, col_tile: int | None = None,
            vmem_limit_bytes: int | None = None,
            donate_cosine: bool = False) -> jax.Array:
    """cosine: (N, C) float, label: (N,) int -> (N, C) logits (cosine's dtype)."""
    N, C = cosine.shape
    sub_mult = 16 if jnp.dtype(cosine.dtype).itemsize == 2 else 8  # bf16 vreg is [16,128]
    lane_mult = 128

    row_target, col_target, auto_vmem = _chip_defaults()
    if vmem_limit_bytes is None:
        vmem_limit_bytes = auto_vmem

    # Pad to (8|16, 128)-aligned, tile-divisible sizes so every store is an
    # unmasked lane-dense vst and no block ever exceeds the intended VMEM size.
    n_pad = _round_up(N, sub_mult)
    c_pad = _round_up(C, lane_mult)
    tn = row_tile if row_tile is not None else _pick_tile(n_pad, row_target, sub_mult)
    tc = col_tile if col_tile is not None else _pick_tile(c_pad, col_target, lane_mult)
    n_full = _round_up(n_pad, tn)
    c_full = _round_up(c_pad, tc)

    label2d = label.astype(jnp.int32).reshape(N, 1)
    if (n_full, c_full) != (N, C):
        cosine_in = jnp.pad(cosine, ((0, n_full - N), (0, c_full - C)))
        label_in = jnp.pad(label2d, ((0, n_full - N), (0, 0)), constant_values=-1)
    else:
        cosine_in, label_in = cosine, label2d

    kernel = functools.partial(
        _arcface_kernel,
        s=float(s),
        s_cos_m=float(s) * math.cos(m),
        s_sin_m=float(s) * math.sin(m),
    )

    compiler_kwargs = {"dimension_semantics": ("parallel", "parallel")}
    if vmem_limit_bytes is not None:
        compiler_kwargs["vmem_limit_bytes"] = int(vmem_limit_bytes)

    # NOTE: keep the class axis as the innermost grid dimension.  The label
    # strip's index_map (i, 0) is constant across j, so Pallas keeps that block
    # resident in VMEM and never re-DMAs it per class tile.
    out = pl.pallas_call(
        kernel,
        out_shape=jax.ShapeDtypeStruct((n_full, c_full), cosine.dtype),
        grid_spec=pltpu.PrefetchScalarGridSpec(
            num_scalar_prefetch=0,
            grid=(n_full // tn, c_full // tc),
            in_specs=[
                pl.BlockSpec((tn, tc), lambda i, j: (i, j)),
                pl.BlockSpec((tn, 1), lambda i, j: (i, 0)),  # resident across class tiles
            ],
            out_specs=pl.BlockSpec((tn, tc), lambda i, j: (i, j)),
        ),
        compiler_params=pltpu.CompilerParams(**compiler_kwargs),
        input_output_aliases=({0: 0} if donate_cosine else {}),
    )(cosine_in, label_in)

    if (n_full, c_full) != (N, C):
        out = out[:N, :C]
    return out


def arcface_ref(cosine, label, s=64.0, m=0.5):
    arc = jnp.arccos(cosine)
    M = jax.nn.one_hot(label, cosine.shape[1], dtype=cosine.dtype) * m
    return jnp.cos(arc + M) * s


if __name__ == "__main__":
    key = jax.random.PRNGKey(0)
    k1, k2, k3, k4 = jax.random.split(key, 4)

    # Small aligned shape; explicit small tiles exercise the 2-D grid
    # (row tiling + class-tile column-offset logic).
    N, C = 8, 256
    cosine = jnp.tanh(jax.random.normal(k1, (N, C), dtype=jnp.float32))
    label = jax.random.randint(k2, (N,), 0, C, dtype=jnp.int32)
    logits = jax.block_until_ready(arcface(cosine, label, s=64.0, m=0.5,
                                           row_tile=8, col_tile=128))
    ref = arcface_ref(cosine, label, s=64.0, m=0.5)
    assert logits.shape == (N, C) and logits.dtype == cosine.dtype
    assert jnp.allclose(logits, ref, atol=1e-3, rtol=1e-3)

    # Unaligned shape: exercises the pad-to-(8,128)-and-slice path with the
    # auto chip-tuned tile picker.
    N2, C2 = 5, 200
    cosine2 = jnp.tanh(jax.random.normal(k3, (N2, C2), dtype=jnp.float32))
    label2 = jax.random.randint(k4, (N2,), 0, C2, dtype=jnp.int32)
    logits2 = jax.block_until_ready(arcface(cosine2, label2, s=64.0, m=0.5))
    ref2 = arcface_ref(cosine2, label2, s=64.0, m=0.5)
    assert logits2.shape == (N2, C2) and logits2.dtype == cosine2.dtype
    assert jnp.allclose(logits2, ref2, atol=1e-3, rtol=1e-3)

    print("KERNEL_OK")
</pallas_src>

<mosaic_0001>
module attributes {stable_mosaic.version = 11 : i64} {
  func.func @_arcface_kernel(%arg0: i32, %arg1: i32, %arg2: memref<8x128xf32, #tpu.memory_space<vmem>>, %arg3: memref<8x1xi32, #tpu.memory_space<vmem>>, %arg4: memref<8x128xf32, #tpu.memory_space<vmem>>) attributes {dimension_semantics = [#tpu.dimension_semantics<parallel>, #tpu.dimension_semantics<parallel>], iteration_bounds = array<i64: 1, 2>, scalar_prefetch = 0 : i64, scratch_operands = 0 : i64, tpu.core_type = #tpu.core_type<tc>, window_params = [{transform_indices = @transform_0, window_bounds = array<i64: 8, 128>}, {transform_indices = @transform_1, window_bounds = array<i64: 8, 1>}, {transform_indices = @transform_2, window_bounds = array<i64: 8, 128>}]} {
    %c0 = arith.constant 0 : index
    %c0_0 = arith.constant 0 : index
    %0 = vector.load %arg2[%c0, %c0_0] : memref<8x128xf32, #tpu.memory_space<vmem>>, vector<8x128xf32>
    %c128_i32 = arith.constant 128 : i32
    %1 = arith.muli %arg1, %c128_i32 : i32
    %c0_1 = arith.constant 0 : index
    %c0_2 = arith.constant 0 : index
    %2 = vector.load %arg3[%c0_1, %c0_2] : memref<8x1xi32, #tpu.memory_space<vmem>>, vector<8x1xi32>
    %3 = vector.broadcast %1 : i32 to vector<8x1xi32>
    %4 = arith.subi %2, %3 : vector<8x1xi32>
    %5 = tpu.iota {dimensions = array<i32: 1>} : vector<8x128xi32>
    %6 = vector.broadcast %4 : vector<8x1xi32> to vector<8x128xi32>
    %7 = arith.cmpi eq, %5, %6 : vector<8x128xi32>
    %8 = arith.mulf %0, %0 : vector<8x128xf32>
    %cst = arith.constant 1.000000e+00 : f32
    %9 = vector.broadcast %cst : f32 to vector<8x128xf32>
    %10 = arith.subf %9, %8 : vector<8x128xf32>
    %11 = math.sqrt %10 : vector<8x128xf32>
    %cst_3 = arith.constant 56.1652832 : f32
    %12 = vector.broadcast %cst_3 : f32 to vector<8x128xf32>
    %13 = arith.mulf %0, %12 : vector<8x128xf32>
    %cst_4 = arith.constant 30.6832352 : f32
    %14 = vector.broadcast %cst_4 : f32 to vector<8x128xf32>
    %15 = arith.mulf %11, %14 : vector<8x128xf32>
    %16 = arith.subf %13, %15 : vector<8x128xf32>
    %cst_5 = arith.constant 6.400000e+01 : f32
    %17 = vector.broadcast %cst_5 : f32 to vector<8x128xf32>
    %18 = arith.mulf %17, %0 : vector<8x128xf32>
    %19 = arith.select %7, %16, %18 : vector<8x128xi1>, vector<8x128xf32>
    %c0_6 = arith.constant 0 : index
    %c0_7 = arith.constant 0 : index
    %20 = vector.load %arg4[%c0_6, %c0_7] : memref<8x128xf32, #tpu.memory_space<vmem>>, vector<8x128xf32>
    tpu.vector_store %arg4[%c0_6, %c0_7], %19 {strides = array<i32>} : memref<8x128xf32, #tpu.memory_space<vmem>>, vector<8x128xf32>,
    return
  }
  func.func @transform_0(%arg0: i32, %arg1: i32) -> (i32, i32) {
    %c0_i32 = arith.constant 0 : i32
    return %arg0, %arg1 : i32, i32
  }
  func.func @transform_1(%arg0: i32, %arg1: i32) -> (i32, i32) {
    %c0_i32 = arith.constant 0 : i32
    %c0_i32_0 = arith.constant 0 : i32
    return %arg0, %c0_i32 : i32, i32
  }
  func.func @transform_2(%arg0: i32, %arg1: i32) -> (i32, i32) {
    %c0_i32 = arith.constant 0 : i32
    return %arg0, %arg1 : i32, i32
  }
}

</mosaic_0001>

<bundles_post_ra>
// kernel: tpu_custom_call.1
= control target key start
LH: loop header
LB: loop body
LE: loop exit
PB: predicated region body
PF: predicated region fallthrough
CT: control target
= control target key end

     0   :  { %7 = vsyncpa [#allocation3], 0  ;;  %s721_s0 = inlined_call_operand.hbm [shape: f32[8,256], index: 0, kind: input, shape index: {}]   ;;  %s722_s1 = inlined_call_operand.vmem [shape: s32[8,1], index: 1, kind: input, shape index: {}]   ;;  %s723_s2 = inlined_call_operand.hbm [shape: f32[8,256], index: 2, kind: output, shape index: {}]  }
   0x1   :  { %9 = vsyncpa [#allocation3 + $0x1], 0 }
   0x2   :  { %10 = vsyncpa [#allocation4], 0 }
   0x3   :  { %12 = vsyncpa [#allocation4 + $0x1], 0  ;;  %s546_s9 = smov 0   ;;  %s548_s10 = smov 0  }
   0x4   :  { %s550_s11 = smov 0   ;;  %s552_s12 = smov 0  }
   0x5   :  { %s554_s13 = smov 0   ;;  %s556_s14 = smov 0  }
   0x6 LB: > { %s333_s15 = sadd.s32 4294967295, %s526_s14   ;;  %s334_s16 = sadd.s32 4294967294, %s526_s14   ;;  %s526_s14 = sphi %s556_s14, %s18_s14   ;;  %s522_s13 = sphi %s554_s13, %s739_s13   ;;  %s518_s12 = sphi %s552_s12, %s738_s12   ;;  %s514_s11 = sphi %s550_s11, %s737_s11   ;;  %s510_s10 = sphi %s548_s10, %s736_s10   ;;  %s506_s9 = sphi %s546_s9, %s735_s9  }
   0x7   : > { %s27_s17 = sadd.s32 1, %s522_s13  ;;  %s39_s18 = sadd.s32 1, %s514_s11 }
   0x8   : > { %p28_p0 = scmp.ge.s32.totalorder %s27_s17, 2  ;;  %p46_p1 = scmp.ne.s32.totalorder %s514_s11, %s510_s10 }
   0x9   : > { %p47_p2 = scmp.eq.s32.totalorder %s526_s14, 0  ;;  %p52_p3 = scmp.ne.s32.totalorder %s510_s10, %s506_s9 }
   0xa   : > { %s741_s17 = smov (%p28_p0, %s27_s17), 0  ;;  %p53_p5 = scmp.eq.s32.totalorder %s333_s15, 0 }
   0xb   : > { %p587_p4 = por %p47_p2, %p46_p1  ;;  %s35_s20 = ssub.s32 %s522_s13, %s741_s17 }
   0xc   : > { %p104_p6 = scmp.eq.s32.totalorder %s333_s15, 1  ;;  %p37_p7 = scmp.eq.s32.totalorder %s35_s20, 0 }
   0xd   : > { %p593_p8 = por %p53_p5, %p52_p3  ;;  %p110_p10 = scmp.eq.s32.totalorder %s334_s16, 1 }
   0xe   : > { %p597_p9 = por %p104_p6, %p46_p1  ;;  %p360_p13 = scmp.lt.s32.totalorder %s526_s14, 2 }
   0xf   : > { %s602_s23 = scalar_select %p37_p7, %s514_s11, %s39_s18  }
  0x10   : > { %s727_s22 = scalar_select %p597_p9, 1, 0 }
  0x11   : > { %p604_p11 = por %p110_p10, %p52_p3  ;;  %s137_s25 = sand.u32 1, %s514_s11  }
  0x12   : > { %s338_s26 = sshll.u32 %s137_s25, 3  ;;  %s339_s27 = sshll.u32 %s522_s13, 7 }
  0x13   : > { %s728_s24 = scalar_select %p604_p11, 1, 0 }
  0x14   : > { %s615_s30 = scalar_lea.hbm %s721_s0, %s339_s27  ;;  %s141_s3 = scalar_lea.vmem [#allocation2], %s338_s26 }
  0x15   : > { %s150_s4 = sshll.u32 %s141_s3, 4  ;;  %p621_p0 = pnand %p360_p13, %p587_p4  ;;  %s617_s4 = int_to_ptr.vmem [resolvable:$true] %s150_s4 }
  0x16   : > { %s138_s6 = scalar_lea.sflag [#allocation3], %s137_s25  ;;  %s414_s7 = scalar_lea.hbm %s615_s30, 128 }
  0x17   : > { %p415_p3 = scmp.ne.s32.totalorder %s615_s30, %s414_s7  ;;  %p416_p5 = pneg %p621_p0 }
  0x18   : > { %s419_s16 = scalar_lea.hbm %s721_s0, 256  ;;  %p420_p4 = scmp.lt.u32.totalorder %s615_s30, %s721_s0 }
  0x19   : > { %p417_p6 = pnand %p416_p5, %p415_p3  ;;  %p421_p10 = scmp.lt.u32.totalorder %s419_s16, %s414_s7 }
  0x1a   : > { %p423_p12 = scmp.lt.u32.totalorder %s414_s7, %s615_s30 }
  0x1b   : > { %p418_p7 = pneg %p417_p6  ;;  %p422_p13 = por %p421_p10, %p420_p4 }
  0x1d   : > { %p424_p1 = por %p423_p12, %p422_p13 }
  0x1f   : > { %p425_p2 = pnand %p424_p1, %p418_p7 }
  0x21   : > { %428 = shalt.err (!%p425_p2)
}
  0x22   : > { %s429_s20 = scalar_lea.vmem %s617_s4, 128  ;;  %s528_s25 = smov [#allocation2]  }
  0x23   : > { %p430_p3 = scmp.ne.s32.totalorder %s617_s4, %s429_s20  ;;  %s434_s26 = sshll.u32 %s528_s25, 4  ;;  %s435_s26 = int_to_ptr.vmem [resolvable:$false] %s434_s26 }
  0x24   : > { %s436_s27 = scalar_lea.vmem %s435_s26, 256  ;;  %p437_p9 = scmp.lt.s32.totalorder %s617_s4, %s435_s26 }
  0x25   : > { %p432_p6 = pnand %p430_p3, %p416_p5  ;;  %p438_p4 = scmp.lt.s32.totalorder %s436_s27, %s429_s20 }
  0x27   : > { %p433_p11 = pneg %p432_p6  ;;  %p439_p10 = por %p438_p4, %p437_p9 }
  0x29   : > { %p440_p12 = pnand %p439_p10, %p433_p11 }
  0x2b   : > { %443 = shalt.err (!%p440_p12)
}
  0x2c   : > { %355 = dma.hbm_to_vmem [thread:$0]  (!%p621_p0), %s615_s30, 128, %s617_s4, %s138_s6  }
  0x2d   : > { %p730_p1 = scmp.lt.s32.totalorder %s526_s14, 3  ;;  %p731_p2 = scmp.ge.s32.totalorder %s526_s14, 1 }
  0x2f   : > { %p156_p5 = pnand %p731_p2, %p730_p1 }
  0x30   : > { %s657_s28 = sand.u32 (!%p156_p5), 1, %s510_s10  }
  0x31   : > { %159 = sbr.rel (%p156_p5) target bundleno = 205 (0xcd), region = 28  ;;  %s341_s29 = sshll.u32 (!%p156_p5), %s657_s28, 3 }
  0x32   : > { %s162_s3 = scalar_lea.sflag (!%p156_p5), [#allocation3], %s657_s28  ;;  %s165_s7 = scalar_lea.vmem (!%p156_p5), [#allocation2], %s341_s29 }
  0x38   : > { %497 = dma.done.wait (%p593_p8), %s162_s3, 128  }
  0x39   : > { %499 = vsyncadd (%p593_p8), %s162_s3, 4294967168  ;;  %v529_v0 = vmov 0   ;;  %s343_s30 = sshll.u32 %s518_s12, 7  ;;  %v196_v2 = vld [vmem:[%s722_s1] sm:$0xff]  ;;  %v199_v12 = vlaneseq  ;;  %s189_s12 = scalar_lea.vmem [#allocation5], %s341_s29 }
  0x3a   : > { %411 = vset.pattern.permute.xlu0 %v529_v0  ;;  %v197_v1 = vstv %s343_s30  ;;  %v194_v4 = vld [vmem:[%s165_s7] sm:$0xff]  ;;  %s236_s21 = sshll.u32 %s189_s12, 4  ;;  %s672_s15 = scalar_lea.hbm %s723_s2, %s343_s30  ;;  %s674_s21 = int_to_ptr.vmem [resolvable:$true] %s236_s21 }
  0x3b   : > { %v198_v3 = vsub.s32 %v196_v2, %v197_v1  ;;  %v205_v5 = vmul.f32 %v194_v4, %v194_v4  ;;  %v214_v13 = vmul.f32 56.165283, %v194_v4  ;;  %v200_v15 = vand.u32 127, %v199_v12  ;;  %s221_s16 = scalar_lea.sflag [#allocation4], %s657_s28  ;;  %s444_s18 = scalar_lea.vmem %s674_s21, 128 }
  0x3c   : > { %v217_v17 = vmul.f32 64.0, %v194_v4  ;;  %p445_p8 = scmp.ne.s32.totalorder %s674_s21, %s444_s18  ;;  %p732_p9 = scmp.ne.s32.totalorder %s727_s22, 0 }
  0x3d   : > { %202 = vperm.xlu0 %411, %v198_v3   ;;  %v206_v6 = vsub.f32 1.0, %v205_v5  ;;  %s530_s19 = smov [#allocation5]  }
  0x3e   : > { %p446_p11 = pnand %p445_p8, %p732_p9  ;;  %s448_s20 = sshll.u32 %s530_s19, 4  ;;  %s449_s20 = int_to_ptr.vmem [resolvable:$false] %s448_s20 }
  0x3f   : > { %412 = vrsqrt.f32 %v206_v6  ;;  %vm209_vm0 = vcmp.eq.f32.partialorder %v206_v6, inf  ;;  %v212_v9 = vand.u32 2147483648, %v206_v6  ;;  %vm211_vm1 = vcmp.eq.f32.partialorder %v206_v6, 0.0  ;;  %s450_s25 = scalar_lea.vmem %s449_s20, 256  ;;  %p451_p7 = scmp.lt.s32.totalorder %s674_s21, %s449_s20 }
  0x40   : > { %p447_p0 = pneg %p446_p11  ;;  %p452_p13 = scmp.lt.s32.totalorder %s450_s25, %s444_s18 }
  0x42   : > { %p453_p3 = por %p452_p13, %p451_p7 }
  0x44   : > { %p454_p6 = pnand %p453_p3, %p447_p0 }
  0x49   : > { %v413_v7 = vpop.eup %412 }
  0x4a   : > { %v208_v8 = vmul.f32 %v413_v7, %v206_v6 }
  0x4c   : > { %v210_v10 = vsel %vm209_vm0, %v206_v6, %v208_v8 }
  0x4d   : > { %v213_v11 = vsel %vm211_vm1, %v212_v9, %v210_v10 }
  0x4e   : > { %v215_v14 = vmul.f32 30.683235, %v213_v11 }
  0x50   : > { %v216_v16 = vsub.f32 %v214_v13, %v215_v14 }
  0xbc   : > { %v203_v18 = vpop.permute.xlu0 %202 }
  0xbd   : > { %vm204_vm2 = vcmp.eq.s32.totalorder %v200_v15, %v203_v18 }
  0xbe   : > { %v218_v19 = vsel %vm204_vm2, %v216_v16, %v217_v17 }
  0xbf   : > { %219 = vst [vmem:[%s189_s12] sm:$0xff] %v218_v19 }
  0xc0   : > { %457 = shalt.err (!%p454_p6)
}
  0xc1   : > { %s458_s26 = scalar_lea.hbm %s672_s15, 128  ;;  %s462_s29 = scalar_lea.hbm %s723_s2, 256 }
  0xc2   : > { %p459_p4 = scmp.ne.s32.totalorder %s672_s15, %s458_s26  ;;  %p463_p1 = scmp.lt.u32.totalorder %s672_s15, %s723_s2 }
  0xc3   : > { %p464_p2 = scmp.lt.u32.totalorder %s462_s29, %s458_s26  ;;  %p466_p8 = scmp.lt.u32.totalorder %s458_s26, %s672_s15 }
  0xc4   : > { %p460_p10 = pnand %p459_p4, %p732_p9 }
  0xc5   : > { %p465_p5 = por %p464_p2, %p463_p1 }
  0xc6   : > { %p461_p12 = pneg %p460_p10 }
  0xc7   : > { %p467_p11 = por %p466_p8, %p465_p5 }
  0xc9   : > { %p468_p0 = pnand %p467_p11, %p461_p12 }
  0xcb   : > { %471 = shalt.err (!%p468_p0)
}
  0xcc   : > { %350 = dma.vmem_to_hbm [thread:$0]  (%p732_p9), %s674_s21, 128, %s672_s15, %s221_s16  }
  0xcd PF: > { %s248_s30 = sand.u32 1, %s506_s9   ;;  %p733_p7 = scmp.ne.s32.totalorder %s728_s24, 0 }
  0xce   : > { %p734_p13 = scmp.ge.s32.totalorder %s526_s14, 2  ;;  %s249_s4 = scalar_lea.sflag [#allocation4], %s248_s30 }
  0xd0   : > { %p357_p3 = pnand %p734_p13, %p733_p7 }
  0xd2   : > { %501 = dma.done.wait (!%p357_p3), %s249_s4, 128  }
  0xd3   : > { %503 = vsyncadd (!%p357_p3), %s249_s4, 4294967168  ;;  %s18_s14 = sadd.s32 1, %s526_s14   ;;  %s735_s9 = smov %s510_s10 }
  0xd4   : > { %p15_p6 = scmp.ge.s32.totalorder %s18_s14, 4   ;;  %s736_s10 = smov %s514_s11 }
  0xd5   : > { %s737_s11 = smov %s602_s23  ;;  %s738_s12 = smov %s522_s13 }
  0xd6   : > { %s739_s13 = smov %s741_s17  ;;  %17 = sbr.rel (!%p15_p6) target bundleno = 6 (0x6), region = 76 }
  0xdd   :  { %254 = vsyncpa [#allocation3], 1 }
  0xde   :  { %256 = vsyncpa [#allocation3 + $0x1], 1 }
  0xdf   :  { %257 = vsyncpa [#allocation4], 1 }
  0xe0   :  { %259 = vsyncpa [#allocation4 + $0x1], 1 }

</bundles_post_ra>
